<compile_context>
chip_gen: v5e
topology: v5e:2x2
jax: 0.10.0
libtpu: 0.0.40
codegen_flags: <defaults>
</compile_context>

<pallas_src>
import functools

import jax
import jax.numpy as jnp
from jax.experimental import pallas as pl
from jax.experimental.pallas import tpu as pltpu


def _round_up(x, m):
    return ((x + m - 1) // m) * m


def _spatial_attn_kernel(x_ref, w1_ref, b1_ref, w2_ref, b2_ref,
                         out_ref, att_ref, *, mm_dtype):
    # x block: (1, C, T) -> work on the (C, T) slice (channels = sublanes,
    # spatial positions = lanes).
    x = x_ref[0].astype(mm_dtype)

    # conv1 (1x1 conv == channel matmul).  BN scale/shift and the conv1 bias
    # were folded into w1/b1 by the wrapper.  bf16 operands, f32 accumulation.
    h = jnp.dot(w1_ref[...], x, preferred_element_type=jnp.float32) + b1_ref[...]

    # Single sweep over h, all in f32 on the VPU (v5e has no bf16 VPU/EUP path
    # and the matmul already produced f32):
    #   * squared L2 norm over channels (for F.normalize)
    #   * conv2 (C -> 1) as multiply + sublane reduce.  Kept on the VPU on
    #     purpose: appending w2 as an extra MXU output row would round the
    #     matmul M dim up to the next 128/256 for a single useful row.
    ssq = jnp.sum(h * h, axis=0, keepdims=True)                        # (1, T)
    s = (jnp.sum(jnp.maximum(h, 0.0) * w2_ref[...], axis=0, keepdims=True)
         + b2_ref[0, 0])                                               # (1, T)

    # F.normalize(p=2, dim=1): h / clamp_min(||h||, 1e-12)
    #                        == h * rsqrt(max(ssq, 1e-24));  rsqrt -> EUP slot.
    inv_nrm = jax.lax.rsqrt(jnp.maximum(ssq, 1e-24))                   # (1, T)

    # Softplus(beta=1, threshold=20): x if x > 20 else log1p(exp(x)); the
    # min() guards exp overflow in the untaken branch.
    att = jnp.where(s > 20.0, s, jnp.log1p(jnp.exp(jnp.minimum(s, 20.0))))

    # Fuse the normalization into the final write: out = h * (att * inv_nrm).
    # Avoids materializing fmn / relu(h) as full (C, T) temporaries.
    row = att * inv_nrm                                                # (1, T)
    out_ref[0] = (h * row).astype(out_ref.dtype)                       # (C, T)
    att_ref[0] = att.astype(att_ref.dtype)                             # (1, T)


def spatial_attention_2d(x_nchw, params, *, tile_hw=None, mm_dtype=jnp.bfloat16):
    """x_nchw: (B, C, H, W). Returns (out (B,C,H,W), att_score (B,1,H,W)).

    mm_dtype: MXU operand dtype (accumulation is always f32).  bf16 by default
              (f32 matmul is 3-6x emulated on all generations; v7x has no
              native f32 MXU path).  Pass jnp.float32 for bit-tight parity
              with the PyTorch reference.
    tile_hw:  max spatial positions per grid step (None -> auto, up to 2048,
              shrunk to fit the per-generation VMEM budget).
    """
    B, C, H, W = x_nchw.shape
    HW = H * W
    x3 = x_nchw.reshape(B, C, HW)                  # free reshape, no transpose

    # ---- fold eval-mode BN + conv1 bias into the conv1 weights ----
    scale = params["gamma"] / jnp.sqrt(params["running_var"] + params["eps"])  # (C,)
    w1_eff = (params["w1"] * scale[:, None]).astype(mm_dtype)                  # (C, C)
    b1_eff = ((params["b1"] - params["running_mean"]) * scale
              + params["beta"]).astype(jnp.float32).reshape(C, 1)              # (C, 1)
    w2_col = params["w2"].reshape(C, 1).astype(jnp.float32)                    # (C, 1)
    b2_sc = params["b2"].reshape(1, 1).astype(jnp.float32)                     # SMEM scalar

    # ---- per-generation VMEM budget ----
    try:
        vmem_cap = int(pltpu.get_tpu_info().vmem_capacity_bytes)  # 128 MiB v5e/v6e, 64 MiB v7x
    except Exception:
        vmem_cap = 64 << 20
    budget = max(min(vmem_cap - (24 << 20), 100 << 20), 16 << 20)

    itemsize = jnp.dtype(x3.dtype).itemsize
    w_bytes = C * C * jnp.dtype(mm_dtype).itemsize + 2 * C * 4  # single-buffered weights

    def _est(tile):
        # x/out tiles (double-buffered) + att tiles + resident weights
        # + in-kernel f32 intermediates (x cast, h, reduce temporaries).
        return (2 * 2 * C * tile * itemsize
                + 2 * 2 * tile * itemsize
                + w_bytes
                + 3 * C * tile * 4
                + (2 << 20))

    max_tile = 2048 if tile_hw is None else int(tile_hw)
    max_tile = max(128, (max_tile // 128) * 128)
    while max_tile > 128 and _est(max_tile) > budget:
        max_tile -= 128

    # ---- spatial tiling; avoid pad/slice HBM round-trips when possible ----
    if HW <= max_tile:
        tile, HWp = HW, HW                     # full-extent lane block, no pad
    elif HW % 128 == 0:
        t = max_tile
        while t > 128 and HW % t:
            t -= 128
        if t >= 512 or HW <= 8 * max_tile:
            tile, HWp = t, HW                  # divisor tile, no pad needed
        else:
            tile, HWp = max_tile, _round_up(HW, max_tile)
    else:
        # TODO(synk): mask the tail tile in-kernel (pltpu.store + lane mask) to
        # drop this pad + slice pass for H*W not a multiple of 128.
        tile, HWp = max_tile, _round_up(HW, max_tile)

    # v7x has 2 TensorCores: make sure the parallel grid exposes >= 2 blocks.
    while B * (HWp // tile) < 2 and tile % 256 == 0:
        tile //= 2

    if HWp != HW:
        # Zero-padded positions only affect their own (discarded) outputs.
        x3 = jnp.pad(x3, ((0, 0), (0, 0), (0, HWp - HW)))

    grid = (B, HWp // tile)
    vmem_limit = int(min(budget, max(_est(tile) + (8 << 20), 32 << 20)))

    row_spec = pl.BlockSpec((1, C, tile), lambda b, t: (b, 0, t))

    def _build(single_buffer_weights):
        if single_buffer_weights:
            # Resident weights (constant index_map): request a single buffer to
            # halve their footprint (matters most on v7x's 64 MiB VMEM).
            const_spec = lambda s: pl.BlockSpec(s, lambda b, t: (0, 0),
                                                pipeline_mode=pl.Buffered(1))
        else:
            const_spec = lambda s: pl.BlockSpec(s, lambda b, t: (0, 0))
        return pl.pallas_call(
            functools.partial(_spatial_attn_kernel, mm_dtype=mm_dtype),
            out_shape=(jax.ShapeDtypeStruct((B, C, HWp), x3.dtype),
                       jax.ShapeDtypeStruct((B, 1, HWp), x3.dtype)),
            grid=grid,
            in_specs=[
                row_spec,                                            # x tile
                const_spec((C, C)),                                  # folded conv1 weight
                const_spec((C, 1)),                                  # folded conv1 bias
                const_spec((C, 1)),                                  # conv2 weight (column)
                pl.BlockSpec(memory_space=pltpu.MemorySpace.SMEM),   # conv2 bias (scalar)
            ],
            out_specs=[
                row_spec,                                            # out, lane-dense
                pl.BlockSpec((1, 1, tile), lambda b, t: (b, 0, t)),  # att, lane-dense
            ],
            compiler_params=pltpu.CompilerParams(
                dimension_semantics=("parallel", "parallel"),
                vmem_limit_bytes=vmem_limit),
        )

    try:
        out3, att3 = _build(True)(x3, w1_eff, b1_eff, w2_col, b2_sc)
    except Exception:
        # Fallback if this jax/Mosaic build rejects pipeline_mode=Buffered(1).
        out3, att3 = _build(False)(x3, w1_eff, b1_eff, w2_col, b2_sc)

    if HWp != HW:
        out3, att3 = out3[:, :, :HW], att3[:, :, :HW]
    return out3.reshape(B, C, H, W), att3.reshape(B, 1, H, W)


def _reference(x_nchw, params):
    """Pure-JAX NCHW reference, faithful to the PyTorch module."""
    h = jnp.einsum("oc,bchw->bohw", params["w1"], x_nchw) \
        + params["b1"][None, :, None, None]
    scale = params["gamma"] / jnp.sqrt(params["running_var"] + params["eps"])
    shift = params["beta"] - params["running_mean"] * scale
    h = h * scale[None, :, None, None] + shift[None, :, None, None]
    nrm = jnp.sqrt(jnp.sum(h * h, axis=1, keepdims=True))
    fmn = h / jnp.maximum(nrm, 1e-12)
    a = jnp.maximum(h, 0.0)
    s = jnp.einsum("oc,bchw->bohw", params["w2"], a) \
        + params["b2"][None, :, None, None]
    att = jnp.where(s > 20.0, s, jnp.log1p(jnp.exp(jnp.minimum(s, 20.0))))
    return att * fmn, att


def _make_params(key, C):
    ks = jax.random.split(key, 8)
    # deterministic synthetic parameters (module __init__ only defines shapes)
    return dict(
        w1=jax.random.normal(ks[0], (C, C), jnp.float32) * 0.2,   # (C_out, C_in)
        b1=jax.random.normal(ks[1], (C,), jnp.float32) * 0.1,
        gamma=1.0 + 0.1 * jax.random.normal(ks[2], (C,), jnp.float32),
        beta=0.1 * jax.random.normal(ks[3], (C,), jnp.float32),
        running_mean=0.1 * jax.random.normal(ks[4], (C,), jnp.float32),
        running_var=jnp.abs(1.0 + 0.1 * jax.random.normal(ks[5], (C,), jnp.float32)),
        eps=jnp.float32(1e-5),
        w2=jax.random.normal(ks[6], (1, C), jnp.float32) * 0.2,   # (C_out=1, C_in)
        b2=jax.random.normal(ks[7], (1,), jnp.float32) * 0.1,
    )
    # TODO(synk): with_aspp=True (ASPP: dilated 3x3 convs + adaptive avg pool +
    # bilinear upsample) is not implemented; only the default with_aspp=False
    # path of SpatialAttention2d is covered by this kernel.


if __name__ == "__main__":
    key = jax.random.PRNGKey(0)
    kx, kp = jax.random.split(key)
    B, C, H, W = 2, 4, 16, 16
    x = jax.random.normal(kx, (B, C, H, W), jnp.float32)
    params = _make_params(kp, C)

    ref_out, ref_att = _reference(x, params)

    # Default path: bf16 MXU operands, f32 accumulation / elementwise chain.
    out, att = spatial_attention_2d(x, params)
    out, att = jax.block_until_ready(out), jax.block_until_ready(att)
    assert out.shape == (B, C, H, W) and att.shape == (B, 1, H, W)
    assert jnp.allclose(out, ref_out, atol=3e-2, rtol=3e-2)
    assert jnp.allclose(att, ref_att, atol=3e-2, rtol=3e-2)

    # f32 parity mode: bit-tight against the PyTorch reference semantics.
    out32, att32 = spatial_attention_2d(x, params, mm_dtype=jnp.float32)
    out32, att32 = jax.block_until_ready(out32), jax.block_until_ready(att32)
    assert jnp.allclose(out32, ref_out, atol=2e-5, rtol=2e-5)
    assert jnp.allclose(att32, ref_att, atol=2e-5, rtol=2e-5)

    print("KERNEL_OK")
</pallas_src>

<mosaic_0001>
module attributes {stable_mosaic.version = 11 : i64} {
  func.func @_spatial_attn_kernel(%arg0: i32, %arg1: i32, %arg2: memref<1x4x256xf32, #tpu.memory_space<vmem>>, %arg3: memref<4x4xbf16, #tpu.memory_space<vmem>>, %arg4: memref<4x1xf32, #tpu.memory_space<vmem>>, %arg5: memref<4x1xf32, #tpu.memory_space<vmem>>, %arg6: memref<1x1xf32, #tpu.memory_space<smem>>, %arg7: memref<1x4x256xf32, #tpu.memory_space<vmem>>, %arg8: memref<1x1x256xf32, #tpu.memory_space<vmem>>) attributes {dimension_semantics = [#tpu.dimension_semantics<parallel>, #tpu.dimension_semantics<parallel>], iteration_bounds = array<i64: 2, 1>, scalar_prefetch = 0 : i64, scratch_operands = 0 : i64, tpu.core_type = #tpu.core_type<tc>, window_params = [{transform_indices = @transform_0, window_bounds = array<i64: 1, 4, 256>}, {pipeline_mode = #tpu.pipeline_mode<synchronous>, transform_indices = @transform_1, window_bounds = array<i64: 4, 4>}, {pipeline_mode = #tpu.pipeline_mode<synchronous>, transform_indices = @transform_2, window_bounds = array<i64: 4, 1>}, {pipeline_mode = #tpu.pipeline_mode<synchronous>, transform_indices = @transform_3, window_bounds = array<i64: 4, 1>}, {transform_indices = @transform_4, window_bounds = array<i64: 1, 1>}, {transform_indices = @transform_5, window_bounds = array<i64: 1, 4, 256>}, {transform_indices = @transform_6, window_bounds = array<i64: 1, 1, 256>}]} {
    %c0 = arith.constant 0 : index
    %c0_0 = arith.constant 0 : index
    %c0_1 = arith.constant 0 : index
    %0 = vector.load %arg2[%c0, %c0_0, %c0_1] : memref<1x4x256xf32, #tpu.memory_space<vmem>>, vector<1x4x256xf32>
    %1 = vector.shape_cast %0 : vector<1x4x256xf32> to vector<4x256xf32>
    %2 = arith.truncf %1 : vector<4x256xf32> to vector<4x256xbf16>
    %c0_2 = arith.constant 0 : index
    %c0_3 = arith.constant 0 : index
    %3 = vector.load %arg3[%c0_2, %c0_3] : memref<4x4xbf16, #tpu.memory_space<vmem>>, vector<4x4xbf16>
    %cst = arith.constant dense<0.000000e+00> : vector<4x256xf32>
    %4 = tpu.matmul %3, %2, %cst {dimension_numbers = #tpu.dot_dimension_numbers<[1], [0], [0], [1], [0, 0, 1, 1], [], []>} : vector<4x4xbf16>, vector<4x256xbf16>, vector<4x256xf32> -> vector<4x256xf32>
    %c0_4 = arith.constant 0 : index
    %c0_5 = arith.constant 0 : index
    %5 = vector.load %arg4[%c0_4, %c0_5] : memref<4x1xf32, #tpu.memory_space<vmem>>, vector<4x1xf32>
    %6 = vector.broadcast %5 : vector<4x1xf32> to vector<4x256xf32>
    %7 = arith.addf %4, %6 : vector<4x256xf32>
    %8 = arith.mulf %7, %7 : vector<4x256xf32>
    %cst_6 = arith.constant dense<0.000000e+00> : vector<256xf32>
    %9 = vector.multi_reduction <add>, %8, %cst_6 [0] : vector<4x256xf32> to vector<256xf32>
    %10 = vector.shape_cast %9 : vector<256xf32> to vector<1x256xf32>
    %cst_7 = arith.constant 0.000000e+00 : f32
    %11 = vector.broadcast %cst_7 : f32 to vector<4x256xf32>
    %12 = arith.maximumf %7, %11 : vector<4x256xf32>
    %c0_8 = arith.constant 0 : index
    %c0_9 = arith.constant 0 : index
    %13 = vector.load %arg5[%c0_8, %c0_9] : memref<4x1xf32, #tpu.memory_space<vmem>>, vector<4x1xf32>
    %14 = vector.broadcast %13 : vector<4x1xf32> to vector<4x256xf32>
    %15 = arith.mulf %12, %14 : vector<4x256xf32>
    %cst_10 = arith.constant dense<0.000000e+00> : vector<256xf32>
    %16 = vector.multi_reduction <add>, %15, %cst_10 [0] : vector<4x256xf32> to vector<256xf32>
    %17 = vector.shape_cast %16 : vector<256xf32> to vector<1x256xf32>
    %c0_11 = arith.constant 0 : index
    %c0_12 = arith.constant 0 : index
    %18 = memref.load %arg6[%c0_11, %c0_12] : memref<1x1xf32, #tpu.memory_space<smem>>
    %19 = vector.broadcast %18 : f32 to vector<1x256xf32>
    %20 = arith.addf %17, %19 : vector<1x256xf32>
    %cst_13 = arith.constant 1.000000e-24 : f32
    %21 = vector.broadcast %cst_13 : f32 to vector<1x256xf32>
    %22 = arith.maximumf %10, %21 : vector<1x256xf32>
    %23 = math.rsqrt %22 : vector<1x256xf32>
    %cst_14 = arith.constant 2.000000e+01 : f32
    %24 = vector.broadcast %cst_14 : f32 to vector<1x256xf32>
    %25 = arith.cmpf ogt, %20, %24 : vector<1x256xf32>
    %cst_15 = arith.constant 2.000000e+01 : f32
    %26 = vector.broadcast %cst_15 : f32 to vector<1x256xf32>
    %27 = arith.minimumf %20, %26 : vector<1x256xf32>
    %28 = math.exp %27 : vector<1x256xf32>
    %29 = math.log1p %28 : vector<1x256xf32>
    %30 = arith.select %25, %20, %29 : vector<1x256xi1>, vector<1x256xf32>
    %31 = arith.mulf %30, %23 : vector<1x256xf32>
    %32 = vector.broadcast %31 : vector<1x256xf32> to vector<4x256xf32>
    %33 = arith.mulf %7, %32 : vector<4x256xf32>
    %c0_16 = arith.constant 0 : index
    %c0_17 = arith.constant 0 : index
    %c0_18 = arith.constant 0 : index
    %34 = vector.load %arg7[%c0_16, %c0_17, %c0_18] : memref<1x4x256xf32, #tpu.memory_space<vmem>>, vector<1x4x256xf32>
    %35 = vector.shape_cast %34 : vector<1x4x256xf32> to vector<4x256xf32>
    %36 = vector.shape_cast %33 : vector<4x256xf32> to vector<1x4x256xf32>
    tpu.vector_store %arg7[%c0_16, %c0_17, %c0_18], %36 {strides = array<i32>} : memref<1x4x256xf32, #tpu.memory_space<vmem>>, vector<1x4x256xf32>,
    %c0_19 = arith.constant 0 : index
    %c0_20 = arith.constant 0 : index
    %c0_21 = arith.constant 0 : index
    %37 = vector.load %arg8[%c0_19, %c0_20, %c0_21] : memref<1x1x256xf32, #tpu.memory_space<vmem>>, vector<1x1x256xf32>
    %38 = vector.shape_cast %37 : vector<1x1x256xf32> to vector<1x256xf32>
    %39 = vector.shape_cast %30 : vector<1x256xf32> to vector<1x1x256xf32>
    tpu.vector_store %arg8[%c0_19, %c0_20, %c0_21], %39 {strides = array<i32>} : memref<1x1x256xf32, #tpu.memory_space<vmem>>, vector<1x1x256xf32>,
    return
  }
  func.func @transform_0(%arg0: i32, %arg1: i32) -> (i32, i32, i32) {
    %c0_i32 = arith.constant 0 : i32
    %c0_i32_0 = arith.constant 0 : i32
    return %arg0, %c0_i32, %arg1 : i32, i32, i32
  }
  func.func @transform_1(%arg0: i32, %arg1: i32) -> (i32, i32) {
    %c0_i32 = arith.constant 0 : i32
    %c0_i32_0 = arith.constant 0 : i32
    %c0_i32_1 = arith.constant 0 : i32
    return %c0_i32, %c0_i32_0 : i32, i32
  }
  func.func @transform_2(%arg0: i32, %arg1: i32) -> (i32, i32) {
    %c0_i32 = arith.constant 0 : i32
    %c0_i32_0 = arith.constant 0 : i32
    %c0_i32_1 = arith.constant 0 : i32
    return %c0_i32, %c0_i32_0 : i32, i32
  }
  func.func @transform_3(%arg0: i32, %arg1: i32) -> (i32, i32) {
    %c0_i32 = arith.constant 0 : i32
    %c0_i32_0 = arith.constant 0 : i32
    %c0_i32_1 = arith.constant 0 : i32
    return %c0_i32, %c0_i32_0 : i32, i32
  }
  func.func @transform_4(%arg0: i32, %arg1: i32) -> (i32, i32) {
    %c0_i32 = arith.constant 0 : i32
    %c0_i32_0 = arith.constant 0 : i32
    %c0_i32_1 = arith.constant 0 : i32
    return %c0_i32, %c0_i32_0 : i32, i32
  }
  func.func @transform_5(%arg0: i32, %arg1: i32) -> (i32, i32, i32) {
    %c0_i32 = arith.constant 0 : i32
    %c0_i32_0 = arith.constant 0 : i32
    return %arg0, %c0_i32, %arg1 : i32, i32, i32
  }
  func.func @transform_6(%arg0: i32, %arg1: i32) -> (i32, i32, i32) {
    %c0_i32 = arith.constant 0 : i32
    %c0_i32_0 = arith.constant 0 : i32
    return %arg0, %c0_i32, %arg1 : i32, i32, i32
  }
}

module attributes {stable_mosaic.version = 11 : i64} {
  func.func @_spatial_attn_kernel(%arg0: i32, %arg1: i32, %arg2: memref<1x4x256xf32, #tpu.memory_space<vmem>>, %arg3: memref<4x4xbf16, #tpu.memory_space<vmem>>, %arg4: memref<4x1xf32, #tpu.memory_space<vmem>>, %arg5: memref<4x1xf32, #tpu.memory_space<vmem>>, %arg6: memref<1x1xf32, #tpu.memory_space<smem>>, %arg7: memref<1x4x256xf32, #tpu.memory_space<vmem>>, %arg8: memref<1x1x256xf32, #tpu.memory_space<vmem>>) attributes {dimension_semantics = [#tpu.dimension_semantics<parallel>, #tpu.dimension_semantics<parallel>], iteration_bounds = array<i64: 2, 1>, scalar_prefetch = 0 : i64, scratch_operands = 0 : i64, tpu.core_type = #tpu.core_type<tc>, window_params = [{transform_indices = @transform_0, window_bounds = array<i64: 1, 4, 256>}, {pipeline_mode = #tpu.pipeline_mode<synchronous>, transform_indices = @transform_1, window_bounds = array<i64: 4, 4>}, {pipeline_mode = #tpu.pipeline_mode<synchronous>, transform_indices = @transform_2, window_bounds = array<i64: 4, 1>}, {pipeline_mode = #tpu.pipeline_mode<synchronous>, transform_indices = @transform_3, window_bounds = array<i64: 4, 1>}, {transform_indices = @transform_4, window_bounds = array<i64: 1, 1>}, {transform_indices = @transform_5, window_bounds = array<i64: 1, 4, 256>}, {transform_indices = @transform_6, window_bounds = array<i64: 1, 1, 256>}]} {
    %c0 = arith.constant 0 : index
    %c0_0 = arith.constant 0 : index
    %c0_1 = arith.constant 0 : index
    %0 = vector.load %arg2[%c0, %c0_0, %c0_1] : memref<1x4x256xf32, #tpu.memory_space<vmem>>, vector<1x4x256xf32>
    %1 = vector.shape_cast %0 : vector<1x4x256xf32> to vector<4x256xf32>
    %2 = arith.truncf %1 : vector<4x256xf32> to vector<4x256xbf16>
    %c0_2 = arith.constant 0 : index
    %c0_3 = arith.constant 0 : index
    %3 = vector.load %arg3[%c0_2, %c0_3] : memref<4x4xbf16, #tpu.memory_space<vmem>>, vector<4x4xbf16>
    %cst = arith.constant dense<0.000000e+00> : vector<4x256xf32>
    %4 = tpu.matmul %3, %2, %cst {dimension_numbers = #tpu.dot_dimension_numbers<[1], [0], [0], [1], [0, 0, 1, 1], [], []>} : vector<4x4xbf16>, vector<4x256xbf16>, vector<4x256xf32> -> vector<4x256xf32>
    %c0_4 = arith.constant 0 : index
    %c0_5 = arith.constant 0 : index
    %5 = vector.load %arg4[%c0_4, %c0_5] : memref<4x1xf32, #tpu.memory_space<vmem>>, vector<4x1xf32>
    %6 = vector.broadcast %5 : vector<4x1xf32> to vector<4x256xf32>
    %7 = arith.addf %4, %6 : vector<4x256xf32>
    %8 = arith.mulf %7, %7 : vector<4x256xf32>
    %cst_6 = arith.constant dense<0.000000e+00> : vector<256xf32>
    %9 = vector.multi_reduction <add>, %8, %cst_6 [0] : vector<4x256xf32> to vector<256xf32>
    %10 = vector.shape_cast %9 : vector<256xf32> to vector<1x256xf32>
    %cst_7 = arith.constant 0.000000e+00 : f32
    %11 = vector.broadcast %cst_7 : f32 to vector<4x256xf32>
    %12 = arith.maximumf %7, %11 : vector<4x256xf32>
    %c0_8 = arith.constant 0 : index
    %c0_9 = arith.constant 0 : index
    %13 = vector.load %arg5[%c0_8, %c0_9] : memref<4x1xf32, #tpu.memory_space<vmem>>, vector<4x1xf32>
    %14 = vector.broadcast %13 : vector<4x1xf32> to vector<4x256xf32>
    %15 = arith.mulf %12, %14 : vector<4x256xf32>
    %cst_10 = arith.constant dense<0.000000e+00> : vector<256xf32>
    %16 = vector.multi_reduction <add>, %15, %cst_10 [0] : vector<4x256xf32> to vector<256xf32>
    %17 = vector.shape_cast %16 : vector<256xf32> to vector<1x256xf32>
    %c0_11 = arith.constant 0 : index
    %c0_12 = arith.constant 0 : index
    %18 = memref.load %arg6[%c0_11, %c0_12] : memref<1x1xf32, #tpu.memory_space<smem>>
    %19 = vector.broadcast %18 : f32 to vector<1x256xf32>
    %20 = arith.addf %17, %19 : vector<1x256xf32>
    %cst_13 = arith.constant 1.000000e-24 : f32
    %21 = vector.broadcast %cst_13 : f32 to vector<1x256xf32>
    %22 = arith.maximumf %10, %21 : vector<1x256xf32>
    %23 = math.rsqrt %22 : vector<1x256xf32>
    %cst_14 = arith.constant 2.000000e+01 : f32
    %24 = vector.broadcast %cst_14 : f32 to vector<1x256xf32>
    %25 = arith.cmpf ogt, %20, %24 : vector<1x256xf32>
    %cst_15 = arith.constant 2.000000e+01 : f32
    %26 = vector.broadcast %cst_15 : f32 to vector<1x256xf32>
    %27 = arith.minimumf %20, %26 : vector<1x256xf32>
    %28 = math.exp %27 : vector<1x256xf32>
    %29 = math.log1p %28 : vector<1x256xf32>
    %30 = arith.select %25, %20, %29 : vector<1x256xi1>, vector<1x256xf32>
    %31 = arith.mulf %30, %23 : vector<1x256xf32>
    %32 = vector.broadcast %31 : vector<1x256xf32> to vector<4x256xf32>
    %33 = arith.mulf %7, %32 : vector<4x256xf32>
    %c0_16 = arith.constant 0 : index
    %c0_17 = arith.constant 0 : index
    %c0_18 = arith.constant 0 : index
    %34 = vector.load %arg7[%c0_16, %c0_17, %c0_18] : memref<1x4x256xf32, #tpu.memory_space<vmem>>, vector<1x4x256xf32>
    %35 = vector.shape_cast %34 : vector<1x4x256xf32> to vector<4x256xf32>
    %36 = vector.shape_cast %33 : vector<4x256xf32> to vector<1x4x256xf32>
    tpu.vector_store %arg7[%c0_16, %c0_17, %c0_18], %36 {strides = array<i32>} : memref<1x4x256xf32, #tpu.memory_space<vmem>>, vector<1x4x256xf32>,
    %c0_19 = arith.constant 0 : index
    %c0_20 = arith.constant 0 : index
    %c0_21 = arith.constant 0 : index
    %37 = vector.load %arg8[%c0_19, %c0_20, %c0_21] : memref<1x1x256xf32, #tpu.memory_space<vmem>>, vector<1x1x256xf32>
    %38 = vector.shape_cast %37 : vector<1x1x256xf32> to vector<1x256xf32>
    %39 = vector.shape_cast %30 : vector<1x256xf32> to vector<1x1x256xf32>
    tpu.vector_store %arg8[%c0_19, %c0_20, %c0_21], %39 {strides = array<i32>} : memref<1x1x256xf32, #tpu.memory_space<vmem>>, vector<1x1x256xf32>,
    return
  }
  func.func @transform_0(%arg0: i32, %arg1: i32) -> (i32, i32, i32) {
    %c0_i32 = arith.constant 0 : i32
    %c0_i32_0 = arith.constant 0 : i32
    return %arg0, %c0_i32, %arg1 : i32, i32, i32
  }
  func.func @transform_1(%arg0: i32, %arg1: i32) -> (i32, i32) {
    %c0_i32 = arith.constant 0 : i32
    %c0_i32_0 = arith.constant 0 : i32
    %c0_i32_1 = arith.constant 0 : i32
    return %c0_i32, %c0_i32_0 : i32, i32
  }
  func.func @transform_2(%arg0: i32, %arg1: i32) -> (i32, i32) {
    %c0_i32 = arith.constant 0 : i32
    %c0_i32_0 = arith.constant 0 : i32
    %c0_i32_1 = arith.constant 0 : i32
    return %c0_i32, %c0_i32_0 : i32, i32
  }
  func.func @transform_3(%arg0: i32, %arg1: i32) -> (i32, i32) {
    %c0_i32 = arith.constant 0 : i32
    %c0_i32_0 = arith.constant 0 : i32
    %c0_i32_1 = arith.constant 0 : i32
    return %c0_i32, %c0_i32_0 : i32, i32
  }
  func.func @transform_4(%arg0: i32, %arg1: i32) -> (i32, i32) {
    %c0_i32 = arith.constant 0 : i32
    %c0_i32_0 = arith.constant 0 : i32
    %c0_i32_1 = arith.constant 0 : i32
    return %c0_i32, %c0_i32_0 : i32, i32
  }
  func.func @transform_5(%arg0: i32, %arg1: i32) -> (i32, i32, i32) {
    %c0_i32 = arith.constant 0 : i32
    %c0_i32_0 = arith.constant 0 : i32
    return %arg0, %c0_i32, %arg1 : i32, i32, i32
  }
  func.func @transform_6(%arg0: i32, %arg1: i32) -> (i32, i32, i32) {
    %c0_i32 = arith.constant 0 : i32
    %c0_i32_0 = arith.constant 0 : i32
    return %arg0, %c0_i32, %arg1 : i32, i32, i32
  }
}

</mosaic_0001>

<bundles_post_ra>
// kernel: tpu_custom_call.1
= control target key start
LH: loop header
LB: loop body
LE: loop exit
PB: predicated region body
PF: predicated region fallthrough
CT: control target
= control target key end

     0   :  { %s1099_s0 = inlined_call_operand.hbm [shape: f32[2,4,256], index: 0, kind: input, shape index: {}]   ;;  %s1100_s1 = inlined_call_operand.vmem [shape: bf16[4,4], index: 1, kind: input, shape index: {}]   ;;  %s1101_s2 = inlined_call_operand.vmem [shape: f32[4,1], index: 2, kind: input, shape index: {}]   ;;  %s1102_s3 = inlined_call_operand.vmem [shape: f32[4,1], index: 3, kind: input, shape index: {}]   ;;  %s1103_s4 = inlined_call_operand.<no memory space> [shape: f32[1,1], index: 4, kind: input, shape index: {}]   ;;  %s1104_s5 = inlined_call_operand.hbm [shape: f32[2,4,256], index: 5, kind: output, shape index: {0}]   ;;  %s1105_s6 = inlined_call_operand.hbm [shape: f32[2,1,256], index: 6, kind: output, shape index: {1}]  }
   0x1   :  { %12 = sst [smem:[#allocation2]] %s1103_s4 }
   0x2   :  { %13 = vsyncpa [#allocation4], 0 }
   0x3   :  { %15 = vsyncpa [#allocation4 + $0x1], 0 }
   0x4   :  { %16 = vsyncpa [#allocation5], 0 }
   0x5   :  { %18 = vsyncpa [#allocation5 + $0x1], 0 }
   0x6   :  { %19 = vsyncpa [#allocation8], 0 }
   0x7   :  { %21 = vsyncpa [#allocation8 + $0x1], 0  ;;  %s922_s23 = smov 0   ;;  %s924_s24 = smov 0  }
   0x8   :  { %s926_s25 = smov 0   ;;  %s928_s26 = smov 0  }
   0x9   :  { %s930_s27 = smov 0   ;;  %s932_s28 = smov 0  }
   0xa LB: > { %s634_s4 = sadd.s32 4294967295, %s881_s28   ;;  %s635_s29 = sadd.s32 4294967294, %s881_s28   ;;  %s881_s28 = sphi %s932_s28, %s27_s28   ;;  %s877_s27 = sphi %s930_s27, %s1116_s27   ;;  %s873_s26 = sphi %s928_s26, %s1115_s26   ;;  %s869_s25 = sphi %s926_s25, %s1114_s25   ;;  %s865_s24 = sphi %s924_s24, %s1113_s24   ;;  %s861_s23 = sphi %s922_s23, %s1112_s23  }
   0xb   : > { %s39_s30 = sadd.s32 1, %s877_s27  ;;  %s48_s7 = sadd.s32 1, %s869_s25 }
   0xc   : > { %p41_p0 = scmp.ge.s32.totalorder %s39_s30, 2  ;;  %p55_p1 = scmp.ne.s32.totalorder %s869_s25, %s865_s24 }
   0xd   : > { %p56_p2 = scmp.eq.s32.totalorder %s881_s28, 0  ;;  %p61_p3 = scmp.ne.s32.totalorder %s865_s24, %s861_s23 }
   0xe   : > { %s1118_s30 = smov (%p41_p0, %s39_s30), 0  ;;  %p62_p5 = scmp.eq.s32.totalorder %s634_s4, 0 }
   0xf   : > { %p963_p4 = por %p56_p2, %p55_p1  ;;  %s43_s9 = ssub.s32 %s877_s27, %s1118_s30 }
  0x10   : > { %p171_p6 = scmp.eq.s32.totalorder %s634_s4, 1  ;;  %p46_p7 = scmp.eq.s32.totalorder %s43_s9, 0 }
  0x11   : > { %p969_p8 = por %p62_p5, %p61_p3  ;;  %p177_p10 = scmp.eq.s32.totalorder %s635_s29, 1 }
  0x12   : > { %p973_p9 = por %p171_p6, %p55_p1  ;;  %p637_p12 = scmp.ge.s32.totalorder %s881_s28, 2 }
  0x13   : > { %s978_s12 = scalar_select %p46_p7, %s869_s25, %s48_s7  }
  0x14   : > { %p980_p11 = por %p177_p10, %p61_p3  ;;  %p673_p13 = scmp.lt.s32.totalorder %s881_s28, 2 }
  0x15   : > { %s237_s14 = sand.u32 1, %s869_s25   ;;  %s654_s16 = sshll.u32 %s877_s27, 3 }
  0x16   : > { %s638_s15 = sshll.u32 %s237_s14, 3  ;;  %s248_s19 = scalar_lea.hbm %s1099_s0, %s654_s16 }
  0x17   : > { %s241_s20 = scalar_lea.vmem [#allocation3], %s638_s15  ;;  %s250_s22 = sshll.u32 %s248_s19, 4  ;;  %s251_s22 = int_to_ptr.hbm [resolvable:$true] %s250_s22 }
  0x18   : > { %s252_s21 = sshll.u32 %s241_s20, 4  ;;  %p663_p0 = pnand %p673_p13, %p963_p4  ;;  %s253_s21 = int_to_ptr.vmem [resolvable:$true] %s252_s21 }
  0x19   : > { %p641_p1 = scmp.ge.s32.totalorder %s881_s28, 1  ;;  %p257_p2 = scmp.lt.s32.totalorder %s881_s28, 3 }
  0x1a   : > { %s238_s4 = scalar_lea.sflag [#allocation4], %s237_s14 }
  0x1b   : > { %665 = dma.hbm_to_vmem [thread:$0]  (!%p663_p0), %s251_s22, 128, %s253_s21, %s238_s4  }
  0x1c   : > { %p258_p3 = pnand %p641_p1, %p257_p2 }
  0x1d   : > { %s996_s29 = sand.u32 (!%p258_p3), 1, %s865_s24  }
  0x1e   : > { %261 = sbr.rel (%p258_p3) target bundleno = 242 (0xf2), region = 40  ;;  %s642_s7 = sshll.u32 (!%p258_p3), %s996_s29, 3 }
  0x1f   : > { %s264_s9 = scalar_lea.sflag (!%p258_p3), [#allocation4], %s996_s29  ;;  %s267_s15 = scalar_lea.vmem (!%p258_p3), [#allocation3], %s642_s7 }
  0x23   : > { %848 = dma.done.wait (%p969_p8), %s264_s9, 128  }
  0x24   : > { %850 = vsyncadd (%p969_p8), %s264_s9, 4294967168  ;;  %v883_v0 = vmov 0   ;;  %v306_v1 = vld [vmem:[%s267_s15] sm:$0xff]  ;;  %v316_v2 = vld [vmem:[%s1101_s2] sm:$0xf]  ;;  %vm326_vm0 = vcmask 1041408  }
  0x25   : > { %724 = vset.pattern.permute.xlu0 %v883_v0  ;;  %308 = vst [vmem:[#allocation1] ss:$2 sm:$0xff] %v306_v1  ;;  %v378_v3 = vld [vmem:[%s1102_s3] sm:$0xf]  ;;  %vm322_vm1 = vcmask 31744   ;;  %vm361_vm2 = vcmask 1043456  }
  0x26   : > { %319 = vperm.xlu0 %724, %v316_v2   ;;  %v315_v10 = vld [vmem:[%s1100_s1] sm:$0x3]  ;;  %s400_s19 = sld [smem:[#allocation2]]  ;;  %s651_s20 = sshll.u32 %s873_s26, 1  ;;  %vm467_vm13 = vcmask 1040384  }
  0x27   : > { %s644_s21 = sshll.u32 %s996_s29, 1  ;;  %s510_s9 = scalar_lea.hbm %s1105_s6, %s651_s20 }
  0x28   : > { %s655_s15 = sshll.u32 %s873_s26, 3  ;;  %s301_s8 = scalar_lea.vmem [#allocation7], %s644_s21 }
  0x29   : > { %s512_s14 = sshll.u32 %s301_s8, 4  ;;  %s514_s16 = sshll.u32 %s510_s9, 4  ;;  %s513_s14 = int_to_ptr.vmem [resolvable:$true] %s512_s14  ;;  %s515_s16 = int_to_ptr.hbm [resolvable:$true] %s514_s16 }
  0x2a   : > { %s1046_s10 = scalar_lea.hbm %s1104_s5, %s655_s15  ;;  %s294_s18 = scalar_lea.vmem [#allocation6], %s642_s7 }
  0x2b   : > { %s498_s20 = sshll.u32 %s1046_s10, 4  ;;  %s481_s21 = scalar_lea.sflag [#allocation8], %s996_s29  ;;  %s499_s20 = int_to_ptr.hbm [resolvable:$true] %s498_s20 }
  0x2c   : > { %v309_v4 = vld.sshfl [vmem:[#allocation1] sm:$0xff pattern:$0x75316420]  ;;  %v310_v5 = vld.sshfl [vmem:[#allocation1 + $0x8] sm:$0xff pattern:$0x75316420]  ;;  %v401_v51 = vstv %s400_s19 }
  0x2d   : > { %v313_v6 = vpack.c.bf16 %v309_v4, %v309_v4  ;;  %v314_v7 = vpack.c.bf16 %v310_v5, %v310_v5  ;;  %s496_s19 = sshll.u32 %s294_s18, 4  ;;  %s781_s22 = sshra.s32 %s515_s16, 4  ;;  %s782_s22 = int_to_ptr.hbm [resolvable:$true] %s781_s22  ;;  %s497_s19 = int_to_ptr.vmem [resolvable:$true] %s496_s19 }
  0x2e   : > { %381 = vperm.xlu0 %724, %v378_v3   ;;  %s783_s4 = scalar_lea.hbm %s782_s22, 2  ;;  %s787_s26 = scalar_lea.hbm %s1105_s6, 4 }
  0x2f   : > { %v328_v8 = vsel %vm326_vm0, %v313_v6, 0  ;;  %v331_v9 = vsel %vm326_vm0, %v314_v7, 0  ;;  %p784_p4 = scmp.ne.s32.totalorder %s782_s22, %s783_s4  ;;  %p788_p7 = scmp.lt.s32.totalorder %s782_s22, %s1105_s6 }
  0x30   : > { %340 = vmatpush.bf16.msra.mxu0 %v328_v8  ;;  %353 = vmatpush.bf16.msra.mxu1 %v331_v9  ;;  %p789_p8 = scmp.lt.s32.totalorder %s787_s26, %s783_s4 }
  0x31   : > { %p785_p5 = pnand %p784_p4, %p973_p9 }
  0x32   : > { %p790_p10 = por %p789_p8, %p788_p7 }
  0x33   : > { %645 = vmatmul.msk.bf16.vlgmr.msra.gmra.mxu0 %vm322_vm1, %v315_v10  ;;  %646 = vmatmul.msk.bf16.vlgmr.msra.gmra.mxu1 %vm322_vm1, %v315_v10  ;;  %p786_p6 = pneg %p785_p5 }
  0x35   : > { %p791_p13 = pnand %p790_p10, %p786_p6 }
  0x98   : > { %v320_v11 = vpop.permute.xlu0 %319 }
  0xa0   : > { %v382_v20 = vpop.permute.xlu0 %381 }
  0xb0   : > { %v342_v12 = vpop.f32.mrf.mxu0  ;;  %v355_v13 = vpop.f32.mrf.mxu1 }
  0xb1   : > { %v1015_v14 = vadd.f32 %v342_v12, %v320_v11  ;;  %v1017_v15 = vadd.f32 %v355_v13, %v320_v11 }
  0xb3   : > { %v359_v16 = vmul.f32 %v1015_v14, %v1015_v14  ;;  %v376_v17 = vmax.f32 %v1015_v14, 0.0  ;;  %v360_v18 = vmul.f32 %v1017_v15, %v1017_v15  ;;  %v377_v19 = vmax.f32 %v1017_v15, 0.0 }
  0xb5   : > { %v362_v21 = vsel %vm361_vm2, %v359_v16, 0.0  ;;  %v384_v22 = vmul.f32 %v382_v20, %v376_v17  ;;  %v369_v23 = vsel %vm361_vm2, %v360_v18, 0.0  ;;  %v385_v24 = vmul.f32 %v382_v20, %v377_v19 }
  0xb6   : > { %v363_v25 = vrot.slane %v362_v21, 4  ;;  %v370_v26 = vrot.slane %v369_v23, 4 }
  0xb7   : > { %v386_v27 = vsel %vm361_vm2, %v384_v22, 0.0  ;;  %v393_v28 = vsel %vm361_vm2, %v385_v24, 0.0 }
  0xb8   : > { %v364_v29 = vadd.f32 %v363_v25, %v362_v21  ;;  %v387_v30 = vrot.slane %v386_v27, 4  ;;  %v371_v31 = vadd.f32 %v370_v26, %v369_v23  ;;  %v394_v32 = vrot.slane %v393_v28, 4  ;;  %v344_v33 = vpop.f32.mrf.mxu0  ;;  %v357_v34 = vpop.f32.mrf.mxu1 }
  0xb9   : > { %v470_v21 = vlaneseq }
  0xba   : > { %v365_v35 = vrot.slane %v364_v29, 2  ;;  %v388_v36 = vadd.f32 %v387_v30, %v386_v27  ;;  %v372_v37 = vrot.slane %v371_v31, 2  ;;  %v395_v38 = vadd.f32 %v394_v32, %v393_v28 }
  0xbb   : > { %vm472_vm14 = vcmp.lt.s32.totalorder %v470_v21, 256 }
  0xbc   : > { %v366_v39 = vadd.f32 %v365_v35, %v364_v29  ;;  %v389_v40 = vrot.slane %v388_v36, 2  ;;  %v373_v41 = vadd.f32 %v372_v37, %v371_v31  ;;  %v396_v42 = vrot.slane %v395_v38, 2 }
  0xbe   : > { %v367_v43 = vrot.slane %v366_v39, 1  ;;  %v390_v44 = vadd.f32 %v389_v40, %v388_v36  ;;  %v374_v45 = vrot.slane %v373_v41, 1  ;;  %v397_v46 = vadd.f32 %v396_v42, %v395_v38 }
  0xc0   : > { %v368_v47 = vadd.f32 %v367_v43, %v366_v39  ;;  %v391_v48 = vrot.slane %v390_v44, 1  ;;  %v375_v49 = vadd.f32 %v374_v45, %v373_v41  ;;  %v398_v50 = vrot.slane %v397_v46, 1 }
  0xc2   : > { %v392_v52 = vadd.f32 %v391_v48, %v390_v44  ;;  %v404_v53 = vmax.f32 %v368_v47, 1e-24  ;;  %v399_v54 = vadd.f32 %v398_v50, %v397_v46  ;;  %v405_v55 = vmax.f32 %v375_v49, 1e-24 }
  0xc4   : > { %v402_v56 = vadd.f32 %v401_v51, %v392_v52  ;;  %725 = vrsqrt.f32 %v404_v53  ;;  %v403_v57 = vadd.f32 %v401_v51, %v399_v54  ;;  %vm412_vm5 = vweird.f32 %v404_v53 }
  0xc5   : > { %727 = vrsqrt.f32 %v405_v55  ;;  %vm422_vm9 = vweird.f32 %v405_v55 }
  0xc6   : > { %v428_v58 = vmin.f32 %v402_v56, 20.0  ;;  %v429_v59 = vmin.f32 %v403_v57, 20.0  ;;  %vm426_vm8 = vcmp.gt.f32.partialorder %v402_v56, 20.0  ;;  %vm427_vm12 = vcmp.gt.f32.partialorder %v403_v57, 20.0 }
  0xc8   : > { %v430_v60 = vmul.f32 1.442695, %v428_v58  ;;  %v432_v61 = vmul.f32 1.442695, %v429_v59 }
  0xca   : > { %v726_v62 = vpop.eup %725  ;;  %729 = vpow2.f32 %v430_v60 }
  0xcb   : > { %v728_v63 = vpop.eup %727  ;;  %v407_v0 = vmul.f32 %v726_v62, %v404_v53  ;;  %731 = vpow2.f32 %v432_v61  ;;  %vm413_vm3 = vweird.f32 %v726_v62 }
  0xcc   : > { %v417_v1 = vmul.f32 %v728_v63, %v405_v55  ;;  %vm423_vm4 = vweird.f32 %v728_v63  ;;  %vm1036_vm7 = vmor %vm412_vm5, %vm413_vm3 }
  0xcd   : > { %v408_v2 = vmul.f32 %v726_v62, %v407_v0  ;;  %vm424_vm11 = vmor %vm422_vm9, %vm423_vm4 }
  0xce   : > { %v418_v3 = vmul.f32 %v728_v63, %v417_v1 }
  0xcf   : > { %v409_v7 = vmul.f32 0.5, %v408_v2 }
  0xd0   : > { %v730_v4 = vpop.eup %729  ;;  %v419_v9 = vmul.f32 0.5, %v418_v3 }
  0xd1   : > { %v732_v5 = vpop.eup %731  ;;  %v434_v6 = vadd.f32 1.0, %v730_v4  ;;  %v437_v8 = vmul.f32 -0.5, %v730_v4  ;;  %v410_v12 = vsub.f32 1.5, %v409_v7  ;;  %v440_v17 = vand.u32 2147483647, %v730_v4 }
  0xd2   : > { %v443_v10 = vadd.f32 1.0, %v732_v5  ;;  %v446_v11 = vmul.f32 -0.5, %v732_v5  ;;  %v420_v16 = vsub.f32 1.5, %v419_v9  ;;  %v449_v19 = vand.u32 2147483647, %v732_v5 }
  0xd3   : > { %733 = vlog2.f32 %v434_v6  ;;  %v438_v13 = vadd.f32 1.0, %v437_v8  ;;  %v411_v23 = vmul.f32 %v726_v62, %v410_v12  ;;  %vm441_vm6 = vcmp.lt.f32.partialorder %v440_v17, 0.0004427343 }
  0xd4   : > { %735 = vlog2.f32 %v443_v10  ;;  %v447_v18 = vadd.f32 1.0, %v446_v11  ;;  %v421_v26 = vmul.f32 %v728_v63, %v420_v16  ;;  %vm450_vm10 = vcmp.lt.f32.partialorder %v449_v19, 0.0004427343 }
  0xd5   : > { %v439_v25 = vmul.f32 %v730_v4, %v438_v13  ;;  %v415_v33 = vsel %vm1036_vm7, %v726_v62, %v411_v23 }
  0xd6   : > { %v448_v28 = vmul.f32 %v732_v5, %v447_v18  ;;  %v425_v34 = vsel %vm424_vm11, %v728_v63, %v421_v26 }
  0xd9   : > { %v734_v20 = vpop.eup %733 }
  0xda   : > { %v736_v22 = vpop.eup %735  ;;  %v436_v24 = vmul.f32 0.6931472, %v734_v20 }
  0xdb   : > { %v445_v27 = vmul.f32 0.6931472, %v736_v22 }
  0xdc   : > { %v442_v30 = vsel %vm441_vm6, %v439_v25, %v436_v24 }
  0xdd   : > { %v452_v31 = vsel %vm426_vm8, %v402_v56, %v442_v30  ;;  %v451_v32 = vsel %vm450_vm10, %v448_v28, %v445_v27 }
  0xde   : > { %v453_v35 = vsel %vm427_vm12, %v403_v57, %v451_v32  ;;  %v454_v36 = vmul.f32 %v452_v31, %v415_v33 }
  0xdf   : > { %v455_v37 = vmul.f32 %v453_v35, %v425_v34  ;;  %v466_v38 = vrot.slane %v453_v35, 7 }
  0xe0   : > { %v456_v41 = vmul.f32 %v454_v36, %v1015_v14 }
  0xe1   : > { %v457_v39 = vmul.f32 %v455_v37, %v1017_v15  ;;  %v468_v40 = vsel %vm467_vm13, %v452_v31, %v466_v38 }
  0xe2   : > { %474 = vst.msk [vmem:[%s301_s8] sm:$0x3] %vm472_vm14, %v468_v40 }
  0xe3   : > { %v460_v42 = vrot.slane %v457_v39, 4 }
  0xe4   : > { %794 = shalt.err (!%p791_p13)
}
  0xe5   : > { %659 = dma.vmem_to_hbm [thread:$0]  (%p973_p9), %s513_s14, 32, %s515_s16, %s481_s21   ;;  %v461_v14 = vsel %vm361_vm2, %v456_v41, %v460_v42 }
  0xe6   : > { %463 = vst [vmem:[%s294_s18] sm:$0xff] %v461_v14  ;;  %s476_s8 = scalar_lea.sflag [#allocation5], %s996_s29  ;;  %s809_s10 = sshra.s32 %s499_s20, 4  ;;  %s810_s10 = int_to_ptr.hbm [resolvable:$true] %s809_s10 }
  0xe7   : > { %s811_s9 = scalar_lea.hbm %s810_s10, 8  ;;  %s815_s15 = scalar_lea.hbm %s1104_s5, 16 }
  0xe8   : > { %p812_p0 = scmp.ne.s32.totalorder %s810_s10, %s811_s9  ;;  %p816_p3 = scmp.lt.s32.totalorder %s810_s10, %s1104_s5 }
  0xe9   : > { %p817_p4 = scmp.lt.s32.totalorder %s815_s15, %s811_s9 }
  0xea   : > { %p813_p1 = pnand %p812_p0, %p973_p9 }
  0xeb   : > { %p818_p5 = por %p817_p4, %p816_p3 }
  0xec   : > { %p814_p2 = pneg %p813_p1 }
  0xee   : > { %p819_p6 = pnand %p818_p5, %p814_p2 }
  0xf0   : > { %822 = shalt.err (!%p819_p6)
}
  0xf1   : > { %658 = dma.vmem_to_hbm [thread:$0]  (%p973_p9), %s497_s19, 128, %s499_s20, %s476_s8  }
  0xf2 PF: > { %s526_s29 = sand.u32 1, %s861_s23   ;;  %p667_p7 = pnand %p637_p12, %p980_p11 }
  0xf3   : > { %s527_s14 = scalar_lea.sflag [#allocation5], %s526_s29 }
  0xf4   : > { %p668_p8 = pneg %p667_p7 }
  0xf6   : > { %852 = dma.done.wait (%p668_p8), %s527_s14, 128  }
  0xf7   : > { %854 = vsyncadd (%p668_p8), %s527_s14, 4294967168  ;;  %s537_s16 = scalar_lea.sflag [#allocation8], %s526_s29 }
  0xf8   : > { %856 = dma.done.wait (%p668_p8), %s537_s16, 32  }
  0xf9   : > { %858 = vsyncadd (%p668_p8), %s537_s16, 4294967264  ;;  %s27_s28 = sadd.s32 1, %s881_s28   ;;  %s1112_s23 = smov %s865_s24 }
  0xfa   : > { %p24_p10 = scmp.ge.s32.totalorder %s27_s28, 4   ;;  %s1113_s24 = smov %s869_s25 }
  0xfb   : > { %s1114_s25 = smov %s978_s12  ;;  %s1115_s26 = smov %s877_s27 }
  0xfc   : > { %s1116_s27 = smov %s1118_s30  ;;  %26 = sbr.rel (!%p24_p10) target bundleno = 10 (0xa), region = 102 }
 0x101   :  { %543 = vsyncpa [#allocation4], 1 }
 0x102   :  { %545 = vsyncpa [#allocation4 + $0x1], 1 }
 0x103   :  { %546 = vsyncpa [#allocation5], 1 }
 0x104   :  { %548 = vsyncpa [#allocation5 + $0x1], 1 }
 0x105   :  { %549 = vsyncpa [#allocation8], 1 }
 0x106   :  { %551 = vsyncpa [#allocation8 + $0x1], 1 }

// kernel: tpu_custom_call.1
= control target key start
LH: loop header
LB: loop body
LE: loop exit
PB: predicated region body
PF: predicated region fallthrough
CT: control target
= control target key end

     0   :  { %s1099_s0 = inlined_call_operand.hbm [shape: f32[2,4,256], index: 0, kind: input, shape index: {}]   ;;  %s1100_s1 = inlined_call_operand.vmem [shape: bf16[4,4], index: 1, kind: input, shape index: {}]   ;;  %s1101_s2 = inlined_call_operand.vmem [shape: f32[4,1], index: 2, kind: input, shape index: {}]   ;;  %s1102_s3 = inlined_call_operand.vmem [shape: f32[4,1], index: 3, kind: input, shape index: {}]   ;;  %s1103_s4 = inlined_call_operand.<no memory space> [shape: f32[1,1], index: 4, kind: input, shape index: {}]   ;;  %s1104_s5 = inlined_call_operand.hbm [shape: f32[2,4,256], index: 5, kind: output, shape index: {0}]   ;;  %s1105_s6 = inlined_call_operand.hbm [shape: f32[2,1,256], index: 6, kind: output, shape index: {1}]  }
   0x1   :  { %12 = sst [smem:[#allocation2]] %s1103_s4 }
   0x2   :  { %13 = vsyncpa [#allocation4], 0 }
   0x3   :  { %15 = vsyncpa [#allocation4 + $0x1], 0 }
   0x4   :  { %16 = vsyncpa [#allocation5], 0 }
   0x5   :  { %18 = vsyncpa [#allocation5 + $0x1], 0 }
   0x6   :  { %19 = vsyncpa [#allocation8], 0 }
   0x7   :  { %21 = vsyncpa [#allocation8 + $0x1], 0  ;;  %s922_s23 = smov 0   ;;  %s924_s24 = smov 0  }
   0x8   :  { %s926_s25 = smov 0   ;;  %s928_s26 = smov 0  }
   0x9   :  { %s930_s27 = smov 0   ;;  %s932_s28 = smov 0  }
   0xa LB: > { %s634_s4 = sadd.s32 4294967295, %s881_s28   ;;  %s635_s29 = sadd.s32 4294967294, %s881_s28   ;;  %s881_s28 = sphi %s932_s28, %s27_s28   ;;  %s877_s27 = sphi %s930_s27, %s1116_s27   ;;  %s873_s26 = sphi %s928_s26, %s1115_s26   ;;  %s869_s25 = sphi %s926_s25, %s1114_s25   ;;  %s865_s24 = sphi %s924_s24, %s1113_s24   ;;  %s861_s23 = sphi %s922_s23, %s1112_s23  }
   0xb   : > { %s39_s30 = sadd.s32 1, %s877_s27  ;;  %s48_s7 = sadd.s32 1, %s869_s25 }
   0xc   : > { %p41_p0 = scmp.ge.s32.totalorder %s39_s30, 2  ;;  %p55_p1 = scmp.ne.s32.totalorder %s869_s25, %s865_s24 }
   0xd   : > { %p56_p2 = scmp.eq.s32.totalorder %s881_s28, 0  ;;  %p61_p3 = scmp.ne.s32.totalorder %s865_s24, %s861_s23 }
   0xe   : > { %s1118_s30 = smov (%p41_p0, %s39_s30), 0  ;;  %p62_p5 = scmp.eq.s32.totalorder %s634_s4, 0 }
   0xf   : > { %p963_p4 = por %p56_p2, %p55_p1  ;;  %s43_s9 = ssub.s32 %s877_s27, %s1118_s30 }
  0x10   : > { %p171_p6 = scmp.eq.s32.totalorder %s634_s4, 1  ;;  %p46_p7 = scmp.eq.s32.totalorder %s43_s9, 0 }
  0x11   : > { %p969_p8 = por %p62_p5, %p61_p3  ;;  %p177_p10 = scmp.eq.s32.totalorder %s635_s29, 1 }
  0x12   : > { %p973_p9 = por %p171_p6, %p55_p1  ;;  %p637_p12 = scmp.ge.s32.totalorder %s881_s28, 2 }
  0x13   : > { %s978_s12 = scalar_select %p46_p7, %s869_s25, %s48_s7  }
  0x14   : > { %p980_p11 = por %p177_p10, %p61_p3  ;;  %p673_p13 = scmp.lt.s32.totalorder %s881_s28, 2 }
  0x15   : > { %s237_s14 = sand.u32 1, %s869_s25   ;;  %s654_s16 = sshll.u32 %s877_s27, 3 }
  0x16   : > { %s638_s15 = sshll.u32 %s237_s14, 3  ;;  %s248_s19 = scalar_lea.hbm %s1099_s0, %s654_s16 }
  0x17   : > { %s241_s20 = scalar_lea.vmem [#allocation3], %s638_s15  ;;  %s250_s22 = sshll.u32 %s248_s19, 4  ;;  %s251_s22 = int_to_ptr.hbm [resolvable:$true] %s250_s22 }
  0x18   : > { %s252_s21 = sshll.u32 %s241_s20, 4  ;;  %p663_p0 = pnand %p673_p13, %p963_p4  ;;  %s253_s21 = int_to_ptr.vmem [resolvable:$true] %s252_s21 }
  0x19   : > { %p641_p1 = scmp.ge.s32.totalorder %s881_s28, 1  ;;  %p257_p2 = scmp.lt.s32.totalorder %s881_s28, 3 }
  0x1a   : > { %s238_s4 = scalar_lea.sflag [#allocation4], %s237_s14 }
  0x1b   : > { %665 = dma.hbm_to_vmem [thread:$0]  (!%p663_p0), %s251_s22, 128, %s253_s21, %s238_s4  }
  0x1c   : > { %p258_p3 = pnand %p641_p1, %p257_p2 }
  0x1d   : > { %s996_s29 = sand.u32 (!%p258_p3), 1, %s865_s24  }
  0x1e   : > { %261 = sbr.rel (%p258_p3) target bundleno = 242 (0xf2), region = 40  ;;  %s642_s7 = sshll.u32 (!%p258_p3), %s996_s29, 3 }
  0x1f   : > { %s264_s9 = scalar_lea.sflag (!%p258_p3), [#allocation4], %s996_s29  ;;  %s267_s15 = scalar_lea.vmem (!%p258_p3), [#allocation3], %s642_s7 }
  0x23   : > { %848 = dma.done.wait (%p969_p8), %s264_s9, 128  }
  0x24   : > { %850 = vsyncadd (%p969_p8), %s264_s9, 4294967168  ;;  %v883_v0 = vmov 0   ;;  %v306_v1 = vld [vmem:[%s267_s15] sm:$0xff]  ;;  %v316_v2 = vld [vmem:[%s1101_s2] sm:$0xf]  ;;  %vm326_vm0 = vcmask 1041408  }
  0x25   : > { %724 = vset.pattern.permute.xlu0 %v883_v0  ;;  %308 = vst [vmem:[#allocation1] ss:$2 sm:$0xff] %v306_v1  ;;  %v378_v3 = vld [vmem:[%s1102_s3] sm:$0xf]  ;;  %vm322_vm1 = vcmask 31744   ;;  %vm361_vm2 = vcmask 1043456  }
  0x26   : > { %319 = vperm.xlu0 %724, %v316_v2   ;;  %v315_v10 = vld [vmem:[%s1100_s1] sm:$0x3]  ;;  %s400_s19 = sld [smem:[#allocation2]]  ;;  %s651_s20 = sshll.u32 %s873_s26, 1  ;;  %vm467_vm13 = vcmask 1040384  }
  0x27   : > { %s644_s21 = sshll.u32 %s996_s29, 1  ;;  %s510_s9 = scalar_lea.hbm %s1105_s6, %s651_s20 }
  0x28   : > { %s655_s15 = sshll.u32 %s873_s26, 3  ;;  %s301_s8 = scalar_lea.vmem [#allocation7], %s644_s21 }
  0x29   : > { %s512_s14 = sshll.u32 %s301_s8, 4  ;;  %s514_s16 = sshll.u32 %s510_s9, 4  ;;  %s513_s14 = int_to_ptr.vmem [resolvable:$true] %s512_s14  ;;  %s515_s16 = int_to_ptr.hbm [resolvable:$true] %s514_s16 }
  0x2a   : > { %s1046_s10 = scalar_lea.hbm %s1104_s5, %s655_s15  ;;  %s294_s18 = scalar_lea.vmem [#allocation6], %s642_s7 }
  0x2b   : > { %s498_s20 = sshll.u32 %s1046_s10, 4  ;;  %s481_s21 = scalar_lea.sflag [#allocation8], %s996_s29  ;;  %s499_s20 = int_to_ptr.hbm [resolvable:$true] %s498_s20 }
  0x2c   : > { %v309_v4 = vld.sshfl [vmem:[#allocation1] sm:$0xff pattern:$0x75316420]  ;;  %v310_v5 = vld.sshfl [vmem:[#allocation1 + $0x8] sm:$0xff pattern:$0x75316420]  ;;  %v401_v51 = vstv %s400_s19 }
  0x2d   : > { %v313_v6 = vpack.c.bf16 %v309_v4, %v309_v4  ;;  %v314_v7 = vpack.c.bf16 %v310_v5, %v310_v5  ;;  %s496_s19 = sshll.u32 %s294_s18, 4  ;;  %s781_s22 = sshra.s32 %s515_s16, 4  ;;  %s782_s22 = int_to_ptr.hbm [resolvable:$true] %s781_s22  ;;  %s497_s19 = int_to_ptr.vmem [resolvable:$true] %s496_s19 }
  0x2e   : > { %381 = vperm.xlu0 %724, %v378_v3   ;;  %s783_s4 = scalar_lea.hbm %s782_s22, 2  ;;  %s787_s26 = scalar_lea.hbm %s1105_s6, 4 }
  0x2f   : > { %v328_v8 = vsel %vm326_vm0, %v313_v6, 0  ;;  %v331_v9 = vsel %vm326_vm0, %v314_v7, 0  ;;  %p784_p4 = scmp.ne.s32.totalorder %s782_s22, %s783_s4  ;;  %p788_p7 = scmp.lt.s32.totalorder %s782_s22, %s1105_s6 }
  0x30   : > { %340 = vmatpush.bf16.msra.mxu0 %v328_v8  ;;  %353 = vmatpush.bf16.msra.mxu1 %v331_v9  ;;  %p789_p8 = scmp.lt.s32.totalorder %s787_s26, %s783_s4 }
  0x31   : > { %p785_p5 = pnand %p784_p4, %p973_p9 }
  0x32   : > { %p790_p10 = por %p789_p8, %p788_p7 }
  0x33   : > { %645 = vmatmul.msk.bf16.vlgmr.msra.gmra.mxu0 %vm322_vm1, %v315_v10  ;;  %646 = vmatmul.msk.bf16.vlgmr.msra.gmra.mxu1 %vm322_vm1, %v315_v10  ;;  %p786_p6 = pneg %p785_p5 }
  0x35   : > { %p791_p13 = pnand %p790_p10, %p786_p6 }
  0x98   : > { %v320_v11 = vpop.permute.xlu0 %319 }
  0xa0   : > { %v382_v20 = vpop.permute.xlu0 %381 }
  0xb0   : > { %v342_v12 = vpop.f32.mrf.mxu0  ;;  %v355_v13 = vpop.f32.mrf.mxu1 }
  0xb1   : > { %v1015_v14 = vadd.f32 %v342_v12, %v320_v11  ;;  %v1017_v15 = vadd.f32 %v355_v13, %v320_v11 }
  0xb3   : > { %v359_v16 = vmul.f32 %v1015_v14, %v1015_v14  ;;  %v376_v17 = vmax.f32 %v1015_v14, 0.0  ;;  %v360_v18 = vmul.f32 %v1017_v15, %v1017_v15  ;;  %v377_v19 = vmax.f32 %v1017_v15, 0.0 }
  0xb5   : > { %v362_v21 = vsel %vm361_vm2, %v359_v16, 0.0  ;;  %v384_v22 = vmul.f32 %v382_v20, %v376_v17  ;;  %v369_v23 = vsel %vm361_vm2, %v360_v18, 0.0  ;;  %v385_v24 = vmul.f32 %v382_v20, %v377_v19 }
  0xb6   : > { %v363_v25 = vrot.slane %v362_v21, 4  ;;  %v370_v26 = vrot.slane %v369_v23, 4 }
  0xb7   : > { %v386_v27 = vsel %vm361_vm2, %v384_v22, 0.0  ;;  %v393_v28 = vsel %vm361_vm2, %v385_v24, 0.0 }
  0xb8   : > { %v364_v29 = vadd.f32 %v363_v25, %v362_v21  ;;  %v387_v30 = vrot.slane %v386_v27, 4  ;;  %v371_v31 = vadd.f32 %v370_v26, %v369_v23  ;;  %v394_v32 = vrot.slane %v393_v28, 4  ;;  %v344_v33 = vpop.f32.mrf.mxu0  ;;  %v357_v34 = vpop.f32.mrf.mxu1 }
  0xb9   : > { %v470_v21 = vlaneseq }
  0xba   : > { %v365_v35 = vrot.slane %v364_v29, 2  ;;  %v388_v36 = vadd.f32 %v387_v30, %v386_v27  ;;  %v372_v37 = vrot.slane %v371_v31, 2  ;;  %v395_v38 = vadd.f32 %v394_v32, %v393_v28 }
  0xbb   : > { %vm472_vm14 = vcmp.lt.s32.totalorder %v470_v21, 256 }
  0xbc   : > { %v366_v39 = vadd.f32 %v365_v35, %v364_v29  ;;  %v389_v40 = vrot.slane %v388_v36, 2  ;;  %v373_v41 = vadd.f32 %v372_v37, %v371_v31  ;;  %v396_v42 = vrot.slane %v395_v38, 2 }
  0xbe   : > { %v367_v43 = vrot.slane %v366_v39, 1  ;;  %v390_v44 = vadd.f32 %v389_v40, %v388_v36  ;;  %v374_v45 = vrot.slane %v373_v41, 1  ;;  %v397_v46 = vadd.f32 %v396_v42, %v395_v38 }
  0xc0   : > { %v368_v47 = vadd.f32 %v367_v43, %v366_v39  ;;  %v391_v48 = vrot.slane %v390_v44, 1  ;;  %v375_v49 = vadd.f32 %v374_v45, %v373_v41  ;;  %v398_v50 = vrot.slane %v397_v46, 1 }
  0xc2   : > { %v392_v52 = vadd.f32 %v391_v48, %v390_v44  ;;  %v404_v53 = vmax.f32 %v368_v47, 1e-24  ;;  %v399_v54 = vadd.f32 %v398_v50, %v397_v46  ;;  %v405_v55 = vmax.f32 %v375_v49, 1e-24 }
  0xc4   : > { %v402_v56 = vadd.f32 %v401_v51, %v392_v52  ;;  %725 = vrsqrt.f32 %v404_v53  ;;  %v403_v57 = vadd.f32 %v401_v51, %v399_v54  ;;  %vm412_vm5 = vweird.f32 %v404_v53 }
  0xc5   : > { %727 = vrsqrt.f32 %v405_v55  ;;  %vm422_vm9 = vweird.f32 %v405_v55 }
  0xc6   : > { %v428_v58 = vmin.f32 %v402_v56, 20.0  ;;  %v429_v59 = vmin.f32 %v403_v57, 20.0  ;;  %vm426_vm8 = vcmp.gt.f32.partialorder %v402_v56, 20.0  ;;  %vm427_vm12 = vcmp.gt.f32.partialorder %v403_v57, 20.0 }
  0xc8   : > { %v430_v60 = vmul.f32 1.442695, %v428_v58  ;;  %v432_v61 = vmul.f32 1.442695, %v429_v59 }
  0xca   : > { %v726_v62 = vpop.eup %725  ;;  %729 = vpow2.f32 %v430_v60 }
  0xcb   : > { %v728_v63 = vpop.eup %727  ;;  %v407_v0 = vmul.f32 %v726_v62, %v404_v53  ;;  %731 = vpow2.f32 %v432_v61  ;;  %vm413_vm3 = vweird.f32 %v726_v62 }
  0xcc   : > { %v417_v1 = vmul.f32 %v728_v63, %v405_v55  ;;  %vm423_vm4 = vweird.f32 %v728_v63  ;;  %vm1036_vm7 = vmor %vm412_vm5, %vm413_vm3 }
  0xcd   : > { %v408_v2 = vmul.f32 %v726_v62, %v407_v0  ;;  %vm424_vm11 = vmor %vm422_vm9, %vm423_vm4 }
  0xce   : > { %v418_v3 = vmul.f32 %v728_v63, %v417_v1 }
  0xcf   : > { %v409_v7 = vmul.f32 0.5, %v408_v2 }
  0xd0   : > { %v730_v4 = vpop.eup %729  ;;  %v419_v9 = vmul.f32 0.5, %v418_v3 }
  0xd1   : > { %v732_v5 = vpop.eup %731  ;;  %v434_v6 = vadd.f32 1.0, %v730_v4  ;;  %v437_v8 = vmul.f32 -0.5, %v730_v4  ;;  %v410_v12 = vsub.f32 1.5, %v409_v7  ;;  %v440_v17 = vand.u32 2147483647, %v730_v4 }
  0xd2   : > { %v443_v10 = vadd.f32 1.0, %v732_v5  ;;  %v446_v11 = vmul.f32 -0.5, %v732_v5  ;;  %v420_v16 = vsub.f32 1.5, %v419_v9  ;;  %v449_v19 = vand.u32 2147483647, %v732_v5 }
  0xd3   : > { %733 = vlog2.f32 %v434_v6  ;;  %v438_v13 = vadd.f32 1.0, %v437_v8  ;;  %v411_v23 = vmul.f32 %v726_v62, %v410_v12  ;;  %vm441_vm6 = vcmp.lt.f32.partialorder %v440_v17, 0.0004427343 }
  0xd4   : > { %735 = vlog2.f32 %v443_v10  ;;  %v447_v18 = vadd.f32 1.0, %v446_v11  ;;  %v421_v26 = vmul.f32 %v728_v63, %v420_v16  ;;  %vm450_vm10 = vcmp.lt.f32.partialorder %v449_v19, 0.0004427343 }
  0xd5   : > { %v439_v25 = vmul.f32 %v730_v4, %v438_v13  ;;  %v415_v33 = vsel %vm1036_vm7, %v726_v62, %v411_v23 }
  0xd6   : > { %v448_v28 = vmul.f32 %v732_v5, %v447_v18  ;;  %v425_v34 = vsel %vm424_vm11, %v728_v63, %v421_v26 }
  0xd9   : > { %v734_v20 = vpop.eup %733 }
  0xda   : > { %v736_v22 = vpop.eup %735  ;;  %v436_v24 = vmul.f32 0.6931472, %v734_v20 }
  0xdb   : > { %v445_v27 = vmul.f32 0.6931472, %v736_v22 }
  0xdc   : > { %v442_v30 = vsel %vm441_vm6, %v439_v25, %v436_v24 }
  0xdd   : > { %v452_v31 = vsel %vm426_vm8, %v402_v56, %v442_v30  ;;  %v451_v32 = vsel %vm450_vm10, %v448_v28, %v445_v27 }
  0xde   : > { %v453_v35 = vsel %vm427_vm12, %v403_v57, %v451_v32  ;;  %v454_v36 = vmul.f32 %v452_v31, %v415_v33 }
  0xdf   : > { %v455_v37 = vmul.f32 %v453_v35, %v425_v34  ;;  %v466_v38 = vrot.slane %v453_v35, 7 }
  0xe0   : > { %v456_v41 = vmul.f32 %v454_v36, %v1015_v14 }
  0xe1   : > { %v457_v39 = vmul.f32 %v455_v37, %v1017_v15  ;;  %v468_v40 = vsel %vm467_vm13, %v452_v31, %v466_v38 }
  0xe2   : > { %474 = vst.msk [vmem:[%s301_s8] sm:$0x3] %vm472_vm14, %v468_v40 }
  0xe3   : > { %v460_v42 = vrot.slane %v457_v39, 4 }
  0xe4   : > { %794 = shalt.err (!%p791_p13)
}
  0xe5   : > { %659 = dma.vmem_to_hbm [thread:$0]  (%p973_p9), %s513_s14, 32, %s515_s16, %s481_s21   ;;  %v461_v14 = vsel %vm361_vm2, %v456_v41, %v460_v42 }
  0xe6   : > { %463 = vst [vmem:[%s294_s18] sm:$0xff] %v461_v14  ;;  %s476_s8 = scalar_lea.sflag [#allocation5], %s996_s29  ;;  %s809_s10 = sshra.s32 %s499_s20, 4  ;;  %s810_s10 = int_to_ptr.hbm [resolvable:$true] %s809_s10 }
  0xe7   : > { %s811_s9 = scalar_lea.hbm %s810_s10, 8  ;;  %s815_s15 = scalar_lea.hbm %s1104_s5, 16 }
  0xe8   : > { %p812_p0 = scmp.ne.s32.totalorder %s810_s10, %s811_s9  ;;  %p816_p3 = scmp.lt.s32.totalorder %s810_s10, %s1104_s5 }
  0xe9   : > { %p817_p4 = scmp.lt.s32.totalorder %s815_s15, %s811_s9 }
  0xea   : > { %p813_p1 = pnand %p812_p0, %p973_p9 }
  0xeb   : > { %p818_p5 = por %p817_p4, %p816_p3 }
  0xec   : > { %p814_p2 = pneg %p813_p1 }
  0xee   : > { %p819_p6 = pnand %p818_p5, %p814_p2 }
  0xf0   : > { %822 = shalt.err (!%p819_p6)
}
  0xf1   : > { %658 = dma.vmem_to_hbm [thread:$0]  (%p973_p9), %s497_s19, 128, %s499_s20, %s476_s8  }
  0xf2 PF: > { %s526_s29 = sand.u32 1, %s861_s23   ;;  %p667_p7 = pnand %p637_p12, %p980_p11 }
  0xf3   : > { %s527_s14 = scalar_lea.sflag [#allocation5], %s526_s29 }
  0xf4   : > { %p668_p8 = pneg %p667_p7 }
  0xf6   : > { %852 = dma.done.wait (%p668_p8), %s527_s14, 128  }
  0xf7   : > { %854 = vsyncadd (%p668_p8), %s527_s14, 4294967168  ;;  %s537_s16 = scalar_lea.sflag [#allocation8], %s526_s29 }
  0xf8   : > { %856 = dma.done.wait (%p668_p8), %s537_s16, 32  }
  0xf9   : > { %858 = vsyncadd (%p668_p8), %s537_s16, 4294967264  ;;  %s27_s28 = sadd.s32 1, %s881_s28   ;;  %s1112_s23 = smov %s865_s24 }
  0xfa   : > { %p24_p10 = scmp.ge.s32.totalorder %s27_s28, 4   ;;  %s1113_s24 = smov %s869_s25 }
  0xfb   : > { %s1114_s25 = smov %s978_s12  ;;  %s1115_s26 = smov %s877_s27 }
  0xfc   : > { %s1116_s27 = smov %s1118_s30  ;;  %26 = sbr.rel (!%p24_p10) target bundleno = 10 (0xa), region = 102 }
 0x101   :  { %543 = vsyncpa [#allocation4], 1 }
 0x102   :  { %545 = vsyncpa [#allocation4 + $0x1], 1 }
 0x103   :  { %546 = vsyncpa [#allocation5], 1 }
 0x104   :  { %548 = vsyncpa [#allocation5 + $0x1], 1 }
 0x105   :  { %549 = vsyncpa [#allocation8], 1 }
 0x106   :  { %551 = vsyncpa [#allocation8 + $0x1], 1 }

</bundles_post_ra>
